<compile_context>
chip_gen: v7x
topology: tpu7x:2x2x1
jax: 0.10.0
libtpu: 0.0.40
codegen_flags: <defaults>
</compile_context>

<pallas_src>
import jax
import jax.numpy as jnp
from jax.experimental import pallas as pl
from jax.experimental.pallas import tpu as pltpu


def _pos_embed_kernel(x_ref, e_ref, o_ref):
    # x_ref: (1, TL, 1)   per-position scalar for one batch row
    # e_ref: (TL, TD)     positional-embedding tile (resident across b)
    # o_ref: (1, TL, TD)
    # Single VPU broadcast-add; cast once to the output dtype.
    o_ref[...] = (x_ref[...] + e_ref[...][None, :, :]).astype(o_ref.dtype)


def _sublane_quantum(*dtypes) -> int:
    """Packed-sublane minimum: 8 rows (4B), 16 (2B), 32 (1B dtypes)."""
    q = 8
    for dt in dtypes:
        q = max(q, 32 // max(jnp.dtype(dt).itemsize, 1))
    return q


def positional_embedding(x: jax.Array, embed: jax.Array,
                         out_dtype=None) -> jax.Array:
    """x: (B, L, 1), embed: (L, D)  ->  (B, L, D) = x + embed (broadcast)."""
    B, L, one = x.shape
    assert one == 1, "last dim of x must be 1 (it is expanded to dim_model)"
    Le, D = embed.shape
    assert Le == L, "sequence length of x must match embed's max_len"
    # Match PyTorch broadcast-add promotion unless the caller overrides
    # (e.g. out_dtype=jnp.bfloat16 to halve write traffic).
    out_dtype = jnp.result_type(x.dtype, embed.dtype) if out_dtype is None else out_dtype

    out_isz = jnp.dtype(out_dtype).itemsize
    emb_isz = jnp.dtype(embed.dtype).itemsize
    x_isz = jnp.dtype(x.dtype).itemsize
    q_l = _sublane_quantum(x.dtype, embed.dtype, out_dtype)

    # ---- Lane (D) tile: prefer full D for fully contiguous output bursts. ----
    MAX_TD = 2048                      # multiple of 128
    TD = D if D <= MAX_TD else MAX_TD

    # ---- Sublane (L) tile: spend the rest of a ~6 MiB/step budget on rows. ----
    # 6 MiB combined (out block + embed block) per step -> ~12-14 MiB VMEM
    # double-buffered; output block lands in the 2-4 MiB sweet spot.
    TARGET_STEP_BYTES = 6 * 1024 * 1024
    TL = max(q_l, TARGET_STEP_BYTES // (TD * (out_isz + emb_isz)))
    if TL >= L:
        TL = L                          # full-dim block: always legal
    else:
        TL = max(q_l, (TL // q_l) * q_l)  # dtype-aware sublane quantum

    nl = pl.cdiv(L, TL)                 # ragged edge blocks are masked by Pallas
    nd = pl.cdiv(D, TD)

    # VMEM footprint: double-buffered out + embed blocks dominate; the x block
    # lane-pads (TL,1)->(TL,128) but stays tiny relative to those.
    needed = (2 * TL * TD * (out_isz + emb_isz)
              + 2 * ((TL + 7) // 8 * 8) * 128 * x_isz)
    # Lift v5e's 16 MiB default; by construction we never need more than ~16 MiB,
    # so this stays far below v7x's 64 MiB physical VMEM.
    vmem_limit = max(32 * 1024 * 1024, min(48 * 1024 * 1024, 2 * needed))

    return pl.pallas_call(
        _pos_embed_kernel,
        out_shape=jax.ShapeDtypeStruct((B, L, D), out_dtype),
        grid_spec=pltpu.PrefetchScalarGridSpec(
            num_scalar_prefetch=0,
            # b innermost: the embed block index is b-independent, so each embed
            # tile is DMA'd from HBM once and stays resident across the batch.
            grid=(nl, nd, B),
            in_specs=[
                # x: one batch row, TL positions, scalar feature (tiny traffic).
                pl.BlockSpec((1, TL, 1), lambda l, d, b: (b, l, 0)),
                # embed: (TL, TD) tile, reused for every b.
                pl.BlockSpec((TL, TD), lambda l, d, b: (l, d)),
            ],
            out_specs=pl.BlockSpec((1, TL, TD), lambda l, d, b: (b, l, d)),
        ),
        compiler_params=pltpu.CompilerParams(
            # No carried state on any axis -> all parallel; lets v7x shard the
            # grid across both TensorCores (no-op on single-TC v5e/v6e).
            # TODO(synk): if L is short and B is large, flatten (l, b) or move B
            # outward for a more balanced 2-TC split on v7x.
            dimension_semantics=("parallel", "parallel", "parallel"),
            vmem_limit_bytes=int(vmem_limit),
        ),
    )(x, embed)


def make_embed(key, max_len: int, dim_model: int) -> jax.Array:
    # Deterministic xavier_normal_ equivalent: std = sqrt(2 / (fan_in + fan_out)).
    std = jnp.sqrt(2.0 / (max_len + dim_model))
    return std * jax.random.normal(key, (max_len, dim_model), dtype=jnp.float32)


if __name__ == "__main__":
    key = jax.random.PRNGKey(0)
    k_embed, k_x = jax.random.split(key)

    # Small shapes consistent with the module: batch=2, max_len=16, dim_model=128.
    B, L, D = 2, 16, 128
    embed = make_embed(k_embed, L, D)
    x = jax.random.normal(k_x, (B, L, 1), dtype=jnp.float32)

    out = positional_embedding(x, embed)
    out = jax.block_until_ready(out)

    # Reference check in plain JAX (same broadcast semantics as torch expand+add).
    ref = x + embed[None, :, :]
    assert out.shape == (B, L, D)
    assert out.dtype == jnp.float32
    assert jnp.allclose(out, ref, atol=1e-6), "mismatch vs reference"

    print("KERNEL_OK")
</pallas_src>

<mosaic_0001>
module attributes {stable_mosaic.version = 11 : i64} {
  func.func @_pos_embed_kernel(%arg0: i32, %arg1: i32, %arg2: i32, %arg3: memref<1x16x1xf32, #tpu.memory_space<vmem>>, %arg4: memref<16x128xf32, #tpu.memory_space<vmem>>, %arg5: memref<1x16x128xf32, #tpu.memory_space<vmem>>) attributes {dimension_semantics = [#tpu.dimension_semantics<parallel>, #tpu.dimension_semantics<parallel>, #tpu.dimension_semantics<parallel>], iteration_bounds = array<i64: 1, 1, 2>, scalar_prefetch = 0 : i64, scratch_operands = 0 : i64, tpu.core_type = #tpu.core_type<tc>, window_params = [{transform_indices = @transform_0, window_bounds = array<i64: 1, 16, 1>}, {transform_indices = @transform_1, window_bounds = array<i64: 16, 128>}, {transform_indices = @transform_2, window_bounds = array<i64: 1, 16, 128>}]} {
    %c0 = arith.constant 0 : index
    %c0_0 = arith.constant 0 : index
    %c0_1 = arith.constant 0 : index
    %0 = vector.load %arg3[%c0, %c0_0, %c0_1] : memref<1x16x1xf32, #tpu.memory_space<vmem>>, vector<1x16x1xf32>
    %c0_2 = arith.constant 0 : index
    %c0_3 = arith.constant 0 : index
    %1 = vector.load %arg4[%c0_2, %c0_3] : memref<16x128xf32, #tpu.memory_space<vmem>>, vector<16x128xf32>
    %2 = vector.shape_cast %1 : vector<16x128xf32> to vector<1x16x128xf32>
    %3 = vector.broadcast %0 : vector<1x16x1xf32> to vector<1x16x128xf32>
    %4 = arith.addf %3, %2 : vector<1x16x128xf32>
    %c0_4 = arith.constant 0 : index
    %c0_5 = arith.constant 0 : index
    %c0_6 = arith.constant 0 : index
    %5 = vector.load %arg5[%c0_4, %c0_5, %c0_6] : memref<1x16x128xf32, #tpu.memory_space<vmem>>, vector<1x16x128xf32>
    tpu.vector_store %arg5[%c0_4, %c0_5, %c0_6], %4 {strides = array<i32>} : memref<1x16x128xf32, #tpu.memory_space<vmem>>, vector<1x16x128xf32>,
    return
  }
  func.func @transform_0(%arg0: i32, %arg1: i32, %arg2: i32) -> (i32, i32, i32) {
    %c0_i32 = arith.constant 0 : i32
    %c0_i32_0 = arith.constant 0 : i32
    return %arg2, %arg0, %c0_i32 : i32, i32, i32
  }
  func.func @transform_1(%arg0: i32, %arg1: i32, %arg2: i32) -> (i32, i32) {
    %c0_i32 = arith.constant 0 : i32
    return %arg0, %arg1 : i32, i32
  }
  func.func @transform_2(%arg0: i32, %arg1: i32, %arg2: i32) -> (i32, i32, i32) {
    %c0_i32 = arith.constant 0 : i32
    return %arg2, %arg0, %arg1 : i32, i32, i32
  }
}

</mosaic_0001>

<bundles_post_ra>
// kernel: tpu_custom_call.1
= control target key start
LH: loop header
LB: loop body
LE: loop exit
PB: predicated region body
PF: predicated region fallthrough
CT: control target
= control target key end

     0   :  { %7 = vsyncpa [#allocation3], 0  ;;  %s646_s0 = inlined_call_operand.vmem [shape: f32[2,16,1], index: 0, kind: input, shape index: {}]   ;;  %s647_s1 = inlined_call_operand.vmem [shape: f32[16,128], index: 1, kind: input, shape index: {}]   ;;  %s648_s2 = inlined_call_operand.hbm [shape: f32[2,16,128], index: 2, kind: output, shape index: {}]  }
   0x1   :  { %9 = vsyncpa [#allocation3 + $0x1], 0  ;;  %s525_s9 = smov 0   ;;  %s527_s10 = smov 0  }
   0x2   :  { %s529_s11 = smov 0   ;;  %s531_s12 = smov 0  }
   0x3   :  { %s533_s13 = smov 0   ;;  %s535_s14 = smov 0  }
   0x4 LB: > { %s351_s15 = sadd.s32 4294967295, %s504_s14   ;;  %s352_s16 = sadd.s32 4294967294, %s504_s14   ;;  %s504_s14 = sphi %s535_s14, %s15_s14   ;;  %s500_s13 = sphi %s533_s13, %s655_s13   ;;  %s496_s12 = sphi %s531_s12, %s654_s12   ;;  %s492_s11 = sphi %s529_s11, %s653_s11   ;;  %s488_s10 = sphi %s527_s10, %s652_s10   ;;  %s484_s9 = sphi %s525_s9, %s651_s9  }
   0x5   : > { %s27_s17 = sadd.s32 1, %s500_s13  ;;  %s101_s18 = sadd.s32 1, %s492_s11 }
   0x6   : > { %p28_p0 = scmp.ge.s32.totalorder %s27_s17, 2  ;;  %p111_p1 = scmp.ne.s32.totalorder %s492_s11, %s488_s10 }
   0x7   : > { %p112_p2 = scmp.eq.s32.totalorder %s351_s15, 1  ;;  %p117_p3 = scmp.ne.s32.totalorder %s488_s10, %s484_s9 }
   0x8   : > { %s657_s17 = smov (%p28_p0, %s27_s17), 0  ;;  %p118_p5 = scmp.eq.s32.totalorder %s352_s16, 1 }
   0x9   : > { %p565_p4 = por %p112_p2, %p111_p1  ;;  %s94_s20 = ssub.s32 %s500_s13, %s657_s17 }
   0xa   : > { %p356_p6 = scmp.ge.s32.totalorder %s504_s14, 1  ;;  %p99_p7 = scmp.eq.s32.totalorder %s94_s20, 0 }
   0xb   : > { %p572_p8 = por %p118_p5, %p117_p3  ;;  %p161_p9 = scmp.lt.s32.totalorder %s504_s14, 3 }
   0xc   : > { %s578_s22 = scalar_select %p99_p7, %s492_s11, %s101_s18  }
   0xd   : > { %p162_p10 = pnand %p356_p6, %p161_p9 }
   0xe   : > { %p196_p11 = scmp.lt.s32.totalorder (!%p162_p10), %s496_s12, 1  ;;  %v506_v0 = vmov (!%p162_p10), 0   ;;  %s192_s28 = sand.u32 (!%p162_p10), 1, %s488_s10   ;;  %v217_v3 = vld [vmem:[%s647_s1] sm:$0xff] (!%p162_p10)  ;;  %v218_v6 = vld [vmem:[%s647_s1 + $0x8] sm:$0xff] (!%p162_p10) }
   0xf   : > { %165 = sbr.rel (%p162_p10) target bundleno = 176 (0xb0), region = 28  ;;  %425 = vset.pattern.permute.xlu0 (!%p162_p10), %v506_v0  ;;  %s357_s29 = sshll.u32 (!%p162_p10), %s192_s28, 4 }
  0x10   : > { %s194_s4 = scalar_lea.vmem (!%p162_p10), [#allocation2], %s357_s29  ;;  %s366_s6 = sshll.u32 (!%p162_p10), %s496_s12, 8 }
  0x11   : > { %s250_s5 = sshll.u32 (!%p162_p10), %s194_s4, 4  ;;  %s598_s18 = scalar_lea.hbm (!%p162_p10), %s648_s2, %s366_s6  ;;  %s593_s5 = int_to_ptr.vmem [resolvable:$true] %s250_s5 }
  0x12   : > { %s600_s20 = scalar_lea.sflag (!%p162_p10), [#allocation3], %s192_s28 }
  0x16   : > { %s197_s23 = scalar_select %p196_p11, %s496_s12, 1 }
  0x17   : > { %s426_s12 = scalar_lea.vmem %s593_s5, 256 }
  0x18   : > { %s365_s24 = sshll.u32 %s197_s23, 4  ;;  %p427_p12 = scmp.ne.s32.totalorder %s593_s5, %s426_s12 }
  0x19   : > { %s203_s27 = scalar_lea.vmem %s646_s0, %s365_s24  ;;  %s507_s23 = smov [#allocation2]  }
  0x1a   : > { %v215_v1 = vld [vmem:[%s203_s27] sm:$0xff]  ;;  %v216_v2 = vld [vmem:[%s203_s27 + $0x8] sm:$0xff]  ;;  %p428_p13 = pnand %p427_p12, %p565_p4  ;;  %s430_s24 = sshll.u32 %s507_s23, 4  ;;  %s431_s24 = int_to_ptr.vmem [resolvable:$false] %s430_s24 }
  0x1b   : > { %221 = vperm.xlu0 %425, %v215_v1   ;;  %s432_s25 = scalar_lea.vmem %s431_s24, 512  ;;  %p433_p1 = scmp.lt.s32.totalorder %s593_s5, %s431_s24 }
  0x1c   : > { %p429_p0 = pneg %p428_p13  ;;  %p434_p2 = scmp.lt.s32.totalorder %s432_s25, %s426_s12 }
  0x1e   : > { %p435_p3 = por %p434_p2, %p433_p1 }
  0x1f   : > { %226 = vperm.xlu0 %425, %v216_v2  }
  0x20   : > { %p436_p5 = pnand %p435_p3, %p429_p0 }
  0x9a   : > { %v222_v4 = vpop.permute.xlu0 %221 }
  0x9b   : > { %v229_v5 = vadd.f32 %v222_v4, %v217_v3 }
  0x9d   : > { %231 = vst [vmem:[%s194_s4] sm:$0xff] %v229_v5 }
  0x9e   : > { %v227_v7 = vpop.permute.xlu0 %226 }
  0x9f   : > { %v230_v8 = vadd.f32 %v227_v7, %v218_v6 }
  0xa1   : > { %232 = vst [vmem:[%s194_s4 + $0x8] sm:$0xff] %v230_v8 }
  0xa2   : > { %439 = shalt.err (!%p436_p5)
}
  0xa3   : > { %s440_s26 = scalar_lea.hbm %s598_s18, 256  ;;  %s444_s29 = scalar_lea.hbm %s648_s2, 512 }
  0xa4   : > { %p441_p6 = scmp.ne.s32.totalorder %s598_s18, %s440_s26  ;;  %p445_p10 = scmp.lt.u32.totalorder %s598_s18, %s648_s2 }
  0xa5   : > { %p446_p11 = scmp.lt.u32.totalorder %s444_s29, %s440_s26  ;;  %p448_p13 = scmp.lt.u32.totalorder %s440_s26, %s598_s18 }
  0xa6   : > { %p442_p7 = pnand %p441_p6, %p565_p4 }
  0xa7   : > { %p447_p12 = por %p446_p11, %p445_p10 }
  0xa8   : > { %p443_p9 = pneg %p442_p7 }
  0xa9   : > { %p449_p0 = por %p448_p13, %p447_p12 }
  0xab   : > { %p450_p1 = pnand %p449_p0, %p443_p9 }
  0xad   : > { %453 = shalt.err (!%p450_p1)
}
  0xae   : > { %s508_s4 = smov 128   ;;  %s509_s6 = smov 8  }
  0xaf   : > { %367 = dma.vmem_to_hbm [thread:$0]  (%p565_p4), %s593_s5, 256, %s598_s18, %s600_s20, %s508_s4, %s508_s4, %s509_s6  }
  0xb0 PF: > { %p373_p2 = scmp.ge.s32.totalorder %s504_s14, 2  ;;  %s265_s7 = sand.u32 1, %s484_s9  }
  0xb1   : > { %s266_s8 = scalar_lea.sflag [#allocation3], %s265_s7 }
  0xb2   : > { %p370_p3 = pnand %p373_p2, %p572_p8 }
  0xb4   : > { %479 = dma.done.wait (!%p370_p3), %s266_s8, 256  }
  0xb5   : > { %481 = vsyncadd (!%p370_p3), %s266_s8, 4294967040  ;;  %s15_s14 = sadd.s32 1, %s504_s14   ;;  %s651_s9 = smov %s488_s10 }
  0xb6   : > { %p12_p5 = scmp.ge.s32.totalorder %s15_s14, 4   ;;  %s652_s10 = smov %s492_s11 }
  0xb7   : > { %s653_s11 = smov %s578_s22  ;;  %s654_s12 = smov %s500_s13 }
  0xb8   : > { %s655_s13 = smov %s657_s17  ;;  %14 = sbr.rel (!%p12_p5) target bundleno = 4 (0x4), region = 66 }
  0xbf   :  { %271 = vsyncpa [#allocation3], 1 }
  0xc0   :  { %273 = vsyncpa [#allocation3 + $0x1], 1 }

</bundles_post_ra>
